<compile_context>
chip_gen: v5e
topology: v5e:2x2
jax: 0.10.0
libtpu: 0.0.40
codegen_flags: <defaults>
</compile_context>

<pallas_src>
import functools

import jax
import jax.numpy as jnp
from jax.experimental import pallas as pl
from jax.experimental.pallas import tpu as pltpu


def _router_kernel(logits_ref, bias_ref, idx_ref, w_ref, *,
                   top_k: int, num_experts: int, tokens_minor: bool):
    e = num_experts
    nbits = max(1, (e - 1).bit_length())
    idx_mask = jnp.int32((1 << nbits) - 1)
    keep_mask = jnp.int32(~((1 << nbits) - 1))
    neg_min = jnp.int32(-(2 ** 31))
    neg_inf = jnp.float32(-jnp.inf)

    raw = logits_ref[...]
    if tokens_minor:
        # Fallback layout: block is already (E, tile_t), tokens on lanes.
        x = raw.astype(jnp.float32)
    else:
        # Preferred layout: (tile_t, E) block straight from the [T, E] array.
        # Cast (no-op for f32) and transpose so tokens land on the 128-lane
        # axis; the XLU work overlaps with the DMA pipeline.
        x = jnp.transpose(raw.astype(jnp.float32))               # (E, tile_t)
    x = x + bias_ref[...].astype(jnp.float32)                    # bias (E, 1) bcast over lanes

    # Branchless monotone (order-preserving) int32 key for the f32 values.
    b = pltpu.bitcast(x, jnp.int32)
    key = b ^ ((b >> 31) & jnp.int32(0x7FFFFFFF))

    # Pack the reversed expert index into the low bits: one sublane max-reduce
    # per k yields (key, argmax) with lowest-index tie-breaking.
    e_iota = jax.lax.broadcasted_iota(jnp.int32, x.shape, 0)
    work = (key & keep_mask) | (jnp.int32(e - 1) - e_iota)

    val_rows = []
    for k in range(top_k):                                       # tiny & static -> unrolled
        win = jnp.max(work, axis=0, keepdims=True)               # (1, tile_t)
        idx = jnp.int32(e - 1) - (win & idx_mask)                # winning expert per token
        # Exact biased logit of the winner (no low-bit truncation).
        val = jnp.max(jnp.where(e_iota == idx, x, neg_inf), axis=0, keepdims=True)
        idx_ref[k:k + 1, :] = idx                                # lane-dense row store
        val_rows.append(val)
        if k + 1 < top_k:
            work = jnp.where(e_iota == idx, neg_min, work)       # knock out the winner

    # Numerically stable softmax over the K selected logits (EUP reciprocal).
    m = val_rows[0]
    for v in val_rows[1:]:
        m = jnp.maximum(m, v)
    exps = [jnp.exp(v - m) for v in val_rows]
    denom = exps[0]
    for ex in exps[1:]:
        denom = denom + ex
    inv = pl.reciprocal(denom, approx=True)
    for k in range(top_k):
        w_ref[k:k + 1, :] = (exps[k] * inv).astype(w_ref.dtype)


_VMEM_BUDGET = 8 * 1024 * 1024  # conservative: fits v5e's 16 MiB default scoped VMEM


def _plan_tiles(t, e, top_k, in_itemsize):
    """Pick (tile_t, padded output length) for a [T, E] router input."""
    lane_e = pl.cdiv(e, 128) * 128        # (tile_t, E) input block is lane-padded in VMEM
    sub_k = pl.cdiv(top_k, 8) * 8         # (K, tile_t) output blocks are sublane-padded
    sub_e = pl.cdiv(e, 8) * 8             # in-kernel (E, tile_t) temporaries
    per_token = (2 * lane_e * in_itemsize        # double-buffered input block
                 + lane_e * 4                    # in-kernel f32 cast of the input block
                 + 2 * 2 * sub_k * 4             # double-buffered idx + weight blocks
                 + 12 * sub_e * 4)               # x / key / work / per-k rows
    cap = max(128, min(16384, (_VMEM_BUDGET // per_token) // 128 * 128))
    if t <= min(cap, 1024):
        return t, t                        # single exact block: no padding, no ragged edge
    n = max(2, pl.cdiv(t, cap))
    n += n % 2                             # even #steps -> balances the two v7x TensorCores
    tile = pl.cdiv(pl.cdiv(t, n), 128) * 128
    return tile, pl.cdiv(t, tile) * tile


def _call_router(x, bias2d, *, top_k, t, e, tile_t, t_out, tokens_minor):
    kernel = functools.partial(_router_kernel, top_k=top_k, num_experts=e,
                               tokens_minor=tokens_minor)
    if tokens_minor:
        logits_spec = pl.BlockSpec((e, tile_t), lambda i: (0, i))   # x is [E, T]
    else:
        logits_spec = pl.BlockSpec((tile_t, e), lambda i: (i, 0))   # x is [T, E]

    idx_t, w_t = pl.pallas_call(
        kernel,
        out_shape=(
            jax.ShapeDtypeStruct((top_k, t_out), jnp.int32),
            jax.ShapeDtypeStruct((top_k, t_out), jnp.float32),
        ),
        grid_spec=pltpu.PrefetchScalarGridSpec(
            num_scalar_prefetch=0,
            grid=(pl.cdiv(t, tile_t),),
            in_specs=[
                logits_spec,
                pl.BlockSpec((e, 1), lambda i: (0, 0)),             # resident bias block
            ],
            out_specs=[
                pl.BlockSpec((top_k, tile_t), lambda i: (0, i)),    # lane-dense outputs
                pl.BlockSpec((top_k, tile_t), lambda i: (0, i)),
            ],
        ),
        compiler_params=pltpu.CompilerParams(dimension_semantics=("parallel",)),
    )(x, bias2d)

    if t_out != t:
        idx_t = idx_t[:, :t]
        w_t = w_t[:, :t]
    # Tiny (K, T) -> (T, K) layout plumbing in the wrapper.
    return idx_t.T, w_t.T


def adaptive_router(gate_logits, bias, top_k):
    """gate_logits: [T, E] (any float dtype), bias: [E]
    -> (indices [T, K] int32, weights [T, K] float32)."""
    t, e = gate_logits.shape
    tile_t, t_out = _plan_tiles(t, e, top_k, gate_logits.dtype.itemsize)
    bias2d = bias.astype(jnp.float32).reshape(e, 1)
    common = dict(top_k=top_k, t=t, e=e, tile_t=tile_t, t_out=t_out)
    try:
        # Preferred: read [T, E] blocks directly (no wrapper-side HBM
        # transpose pass), transpose to lane-dense layout inside the kernel.
        return _call_router(gate_logits, bias2d, tokens_minor=False, **common)
    except Exception:
        # Fallback if the in-kernel transpose does not lower for this shape:
        # one extra XLA transpose pass over gate_logits (previous layout).
        return _call_router(gate_logits.T, bias2d, tokens_minor=True, **common)


class _DeterministicThermalSignal:
    """Stand-in for the thermal_signal_generator: fixed per-expert priorities."""

    def __init__(self, num_experts):
        # deterministic, partial dict (some experts missing -> 0.0), like the torch path
        self._prio = {str(i): ((-1.0) ** i) * 0.1 * i for i in range(0, num_experts, 2)}

    def get_expert_priorities(self):
        return self._prio


def _bias_from_priorities(priorities, num_experts):
    return jnp.array(
        [priorities.get(str(i), 0.0) for i in range(num_experts)], dtype=jnp.float32
    )


def _check(gate_logits, bias, top_k, idx, w, val_atol=1e-5, w_atol=5e-3):
    biased = gate_logits.astype(jnp.float32) + bias[None, :]
    ref_vals, ref_idx = jax.lax.top_k(biased, top_k)
    ref_w = jax.nn.softmax(ref_vals, axis=-1)
    assert idx.shape == (gate_logits.shape[0], top_k) and w.shape == idx.shape
    assert bool(jnp.all((idx >= 0) & (idx < gate_logits.shape[-1])))
    # Compare the *selected biased logits* (robust to ULP-level ties) + weights.
    got_vals = jnp.take_along_axis(biased, idx, axis=-1)
    assert jnp.allclose(got_vals, ref_vals, atol=val_atol)
    assert jnp.allclose(w, ref_w, atol=w_atol)
    assert jnp.allclose(jnp.sum(w, axis=-1), 1.0, atol=w_atol)
    return ref_idx.astype(jnp.int32)


if __name__ == "__main__":
    # Small shapes consistent with the module: batch=2, seq=8, 8 experts, top-2.
    num_experts, top_k = 8, 2
    batch, seq = 2, 8
    tokens = batch * seq  # T = 16

    key0, key1, key2 = jax.random.split(jax.random.PRNGKey(0), 3)
    gate_logits = jax.random.normal(key0, (tokens, num_experts), dtype=jnp.float32)

    gen = _DeterministicThermalSignal(num_experts)
    bias = _bias_from_priorities(gen.get_expert_priorities(), num_experts)

    topk_indices, routing_weights = adaptive_router(gate_logits, bias, top_k)
    jax.block_until_ready((topk_indices, routing_weights))
    ref_idx = _check(gate_logits, bias, top_k, topk_indices, routing_weights)
    assert jnp.array_equal(topk_indices, ref_idx)  # exact indices on the small case

    # Second check: single unaligned (exact) block + top-3.
    gl2 = jax.random.normal(key1, (500, 8), dtype=jnp.float32)
    b2 = _bias_from_priorities(_DeterministicThermalSignal(8).get_expert_priorities(), 8)
    idx2, w2 = adaptive_router(gl2, b2, 3)
    jax.block_until_ready((idx2, w2))
    _check(gl2, b2, 3, idx2, w2)

    # Third check: multi-step grid with a ragged last block, bf16 logits DMA'd
    # without a wrapper-side upcast.
    gl3 = jax.random.normal(key2, (2500, 8), dtype=jnp.float32).astype(jnp.bfloat16)
    idx3, w3 = adaptive_router(gl3, b2, 2)
    jax.block_until_ready((idx3, w3))
    _check(gl3, b2, 2, idx3, w3)

    print("KERNEL_OK")
</pallas_src>

<mosaic_0001>
module attributes {stable_mosaic.version = 11 : i64} {
  func.func @_router_kernel(%arg0: i32, %arg1: memref<16x8xf32, #tpu.memory_space<vmem>>, %arg2: memref<8x1xf32, #tpu.memory_space<vmem>>, %arg3: memref<2x16xi32, #tpu.memory_space<vmem>>, %arg4: memref<2x16xf32, #tpu.memory_space<vmem>>) attributes {dimension_semantics = [#tpu.dimension_semantics<parallel>], iteration_bounds = array<i64: 1>, scalar_prefetch = 0 : i64, scratch_operands = 0 : i64, tpu.core_type = #tpu.core_type<tc>, window_params = [{transform_indices = @transform_0, window_bounds = array<i64: 16, 8>}, {pipeline_mode = #tpu.pipeline_mode<synchronous>, transform_indices = @transform_1, window_bounds = array<i64: 8, 1>}, {transform_indices = @transform_2, window_bounds = array<i64: 2, 16>}, {transform_indices = @transform_3, window_bounds = array<i64: 2, 16>}]} {
    %c0 = arith.constant 0 : index
    %c0_0 = arith.constant 0 : index
    %0 = vector.load %arg1[%c0, %c0_0] : memref<16x8xf32, #tpu.memory_space<vmem>>, vector<16x8xf32>
    %1 = tpu.transpose %0, [1, 0] : vector<16x8xf32> -> vector<8x16xf32>
    %c0_1 = arith.constant 0 : index
    %c0_2 = arith.constant 0 : index
    %2 = vector.load %arg2[%c0_1, %c0_2] : memref<8x1xf32, #tpu.memory_space<vmem>>, vector<8x1xf32>
    %3 = vector.broadcast %2 : vector<8x1xf32> to vector<8x16xf32>
    %4 = arith.addf %1, %3 : vector<8x16xf32>
    %5 = tpu.bitcast %4 : vector<8x16xf32> -> vector<8x16xi32>
    %c31_i32 = arith.constant 31 : i32
    %6 = vector.broadcast %c31_i32 : i32 to vector<8x16xi32>
    %7 = arith.shrsi %5, %6 : vector<8x16xi32>
    %c2147483647_i32 = arith.constant 2147483647 : i32
    %8 = vector.broadcast %c2147483647_i32 : i32 to vector<8x16xi32>
    %9 = arith.andi %7, %8 : vector<8x16xi32>
    %10 = arith.xori %5, %9 : vector<8x16xi32>
    %11 = tpu.iota {dimensions = array<i32: 0>} : vector<8x16xi32>
    %c-8_i32 = arith.constant -8 : i32
    %12 = vector.broadcast %c-8_i32 : i32 to vector<8x16xi32>
    %13 = arith.andi %10, %12 : vector<8x16xi32>
    %c7_i32 = arith.constant 7 : i32
    %14 = vector.broadcast %c7_i32 : i32 to vector<8x16xi32>
    %15 = arith.subi %14, %11 : vector<8x16xi32>
    %16 = arith.ori %13, %15 : vector<8x16xi32>
    %cst = arith.constant dense<-2147483648> : vector<16xi32>
    %17 = vector.multi_reduction <maxsi>, %16, %cst [0] : vector<8x16xi32> to vector<16xi32>
    %18 = vector.shape_cast %17 : vector<16xi32> to vector<1x16xi32>
    %c7_i32_3 = arith.constant 7 : i32
    %19 = vector.broadcast %c7_i32_3 : i32 to vector<1x16xi32>
    %20 = arith.andi %18, %19 : vector<1x16xi32>
    %c7_i32_4 = arith.constant 7 : i32
    %21 = vector.broadcast %c7_i32_4 : i32 to vector<1x16xi32>
    %22 = arith.subi %21, %20 : vector<1x16xi32>
    %23 = vector.broadcast %22 : vector<1x16xi32> to vector<8x16xi32>
    %24 = arith.cmpi eq, %11, %23 : vector<8x16xi32>
    %cst_5 = arith.constant 0xFF800000 : f32
    %25 = vector.broadcast %cst_5 : f32 to vector<8x16xf32>
    %26 = arith.select %24, %4, %25 : vector<8x16xi1>, vector<8x16xf32>
    %cst_6 = arith.constant dense<0xFF800000> : vector<16xf32>
    %27 = vector.multi_reduction <maximumf>, %26, %cst_6 [0] : vector<8x16xf32> to vector<16xf32>
    %28 = vector.shape_cast %27 : vector<16xf32> to vector<1x16xf32>
    %c0_7 = arith.constant 0 : index
    %c0_8 = arith.constant 0 : index
    %29 = vector.load %arg3[%c0_7, %c0_8] : memref<2x16xi32, #tpu.memory_space<vmem>>, vector<1x16xi32>
    tpu.vector_store %arg3[%c0_7, %c0_8], %22 {strides = array<i32>} : memref<2x16xi32, #tpu.memory_space<vmem>>, vector<1x16xi32>,
    %30 = vector.broadcast %22 : vector<1x16xi32> to vector<8x16xi32>
    %31 = arith.cmpi eq, %11, %30 : vector<8x16xi32>
    %c-2147483648_i32 = arith.constant -2147483648 : i32
    %32 = vector.broadcast %c-2147483648_i32 : i32 to vector<8x16xi32>
    %33 = arith.select %31, %32, %16 : vector<8x16xi1>, vector<8x16xi32>
    %cst_9 = arith.constant dense<-2147483648> : vector<16xi32>
    %34 = vector.multi_reduction <maxsi>, %33, %cst_9 [0] : vector<8x16xi32> to vector<16xi32>
    %35 = vector.shape_cast %34 : vector<16xi32> to vector<1x16xi32>
    %c7_i32_10 = arith.constant 7 : i32
    %36 = vector.broadcast %c7_i32_10 : i32 to vector<1x16xi32>
    %37 = arith.andi %35, %36 : vector<1x16xi32>
    %c7_i32_11 = arith.constant 7 : i32
    %38 = vector.broadcast %c7_i32_11 : i32 to vector<1x16xi32>
    %39 = arith.subi %38, %37 : vector<1x16xi32>
    %40 = vector.broadcast %39 : vector<1x16xi32> to vector<8x16xi32>
    %41 = arith.cmpi eq, %11, %40 : vector<8x16xi32>
    %cst_12 = arith.constant 0xFF800000 : f32
    %42 = vector.broadcast %cst_12 : f32 to vector<8x16xf32>
    %43 = arith.select %41, %4, %42 : vector<8x16xi1>, vector<8x16xf32>
    %cst_13 = arith.constant dense<0xFF800000> : vector<16xf32>
    %44 = vector.multi_reduction <maximumf>, %43, %cst_13 [0] : vector<8x16xf32> to vector<16xf32>
    %45 = vector.shape_cast %44 : vector<16xf32> to vector<1x16xf32>
    %c1 = arith.constant 1 : index
    %c0_14 = arith.constant 0 : index
    %46 = vector.load %arg3[%c1, %c0_14] : memref<2x16xi32, #tpu.memory_space<vmem>>, vector<1x16xi32>
    tpu.vector_store %arg3[%c1, %c0_14], %39 {strides = array<i32>} : memref<2x16xi32, #tpu.memory_space<vmem>>, vector<1x16xi32>,
    %47 = arith.maximumf %28, %45 : vector<1x16xf32>
    %48 = arith.subf %28, %47 : vector<1x16xf32>
    %49 = math.exp %48 : vector<1x16xf32>
    %50 = arith.subf %45, %47 : vector<1x16xf32>
    %51 = math.exp %50 : vector<1x16xf32>
    %52 = arith.addf %49, %51 : vector<1x16xf32>
    %53 = tpu.reciprocal %52 {approx = true} : vector<1x16xf32> -> vector<1x16xf32>
    %54 = arith.mulf %49, %53 : vector<1x16xf32>
    %c0_15 = arith.constant 0 : index
    %c0_16 = arith.constant 0 : index
    %55 = vector.load %arg4[%c0_15, %c0_16] : memref<2x16xf32, #tpu.memory_space<vmem>>, vector<1x16xf32>
    tpu.vector_store %arg4[%c0_15, %c0_16], %54 {strides = array<i32>} : memref<2x16xf32, #tpu.memory_space<vmem>>, vector<1x16xf32>,
    %56 = arith.mulf %51, %53 : vector<1x16xf32>
    %c1_17 = arith.constant 1 : index
    %c0_18 = arith.constant 0 : index
    %57 = vector.load %arg4[%c1_17, %c0_18] : memref<2x16xf32, #tpu.memory_space<vmem>>, vector<1x16xf32>
    tpu.vector_store %arg4[%c1_17, %c0_18], %56 {strides = array<i32>} : memref<2x16xf32, #tpu.memory_space<vmem>>, vector<1x16xf32>,
    return
  }
  func.func @transform_0(%arg0: i32) -> (i32, i32) {
    %c0_i32 = arith.constant 0 : i32
    %c0_i32_0 = arith.constant 0 : i32
    return %arg0, %c0_i32 : i32, i32
  }
  func.func @transform_1(%arg0: i32) -> (i32, i32) {
    %c0_i32 = arith.constant 0 : i32
    %c0_i32_0 = arith.constant 0 : i32
    %c0_i32_1 = arith.constant 0 : i32
    return %c0_i32, %c0_i32_0 : i32, i32
  }
  func.func @transform_2(%arg0: i32) -> (i32, i32) {
    %c0_i32 = arith.constant 0 : i32
    %c0_i32_0 = arith.constant 0 : i32
    return %c0_i32, %arg0 : i32, i32
  }
  func.func @transform_3(%arg0: i32) -> (i32, i32) {
    %c0_i32 = arith.constant 0 : i32
    %c0_i32_0 = arith.constant 0 : i32
    return %c0_i32, %arg0 : i32, i32
  }
}

module attributes {stable_mosaic.version = 11 : i64} {
  func.func @_router_kernel(%arg0: i32, %arg1: memref<8x16xf32, #tpu.memory_space<vmem>>, %arg2: memref<8x1xf32, #tpu.memory_space<vmem>>, %arg3: memref<2x16xi32, #tpu.memory_space<vmem>>, %arg4: memref<2x16xf32, #tpu.memory_space<vmem>>) attributes {dimension_semantics = [#tpu.dimension_semantics<parallel>], iteration_bounds = array<i64: 1>, scalar_prefetch = 0 : i64, scratch_operands = 0 : i64, tpu.core_type = #tpu.core_type<tc>, window_params = [{transform_indices = @transform_0, window_bounds = array<i64: 8, 16>}, {pipeline_mode = #tpu.pipeline_mode<synchronous>, transform_indices = @transform_1, window_bounds = array<i64: 8, 1>}, {transform_indices = @transform_2, window_bounds = array<i64: 2, 16>}, {transform_indices = @transform_3, window_bounds = array<i64: 2, 16>}]} {
    %c0 = arith.constant 0 : index
    %c0_0 = arith.constant 0 : index
    %0 = vector.load %arg1[%c0, %c0_0] : memref<8x16xf32, #tpu.memory_space<vmem>>, vector<8x16xf32>
    %c0_1 = arith.constant 0 : index
    %c0_2 = arith.constant 0 : index
    %1 = vector.load %arg2[%c0_1, %c0_2] : memref<8x1xf32, #tpu.memory_space<vmem>>, vector<8x1xf32>
    %2 = vector.broadcast %1 : vector<8x1xf32> to vector<8x16xf32>
    %3 = arith.addf %0, %2 : vector<8x16xf32>
    %4 = tpu.bitcast %3 : vector<8x16xf32> -> vector<8x16xi32>
    %c31_i32 = arith.constant 31 : i32
    %5 = vector.broadcast %c31_i32 : i32 to vector<8x16xi32>
    %6 = arith.shrsi %4, %5 : vector<8x16xi32>
    %c2147483647_i32 = arith.constant 2147483647 : i32
    %7 = vector.broadcast %c2147483647_i32 : i32 to vector<8x16xi32>
    %8 = arith.andi %6, %7 : vector<8x16xi32>
    %9 = arith.xori %4, %8 : vector<8x16xi32>
    %10 = tpu.iota {dimensions = array<i32: 0>} : vector<8x16xi32>
    %c-8_i32 = arith.constant -8 : i32
    %11 = vector.broadcast %c-8_i32 : i32 to vector<8x16xi32>
    %12 = arith.andi %9, %11 : vector<8x16xi32>
    %c7_i32 = arith.constant 7 : i32
    %13 = vector.broadcast %c7_i32 : i32 to vector<8x16xi32>
    %14 = arith.subi %13, %10 : vector<8x16xi32>
    %15 = arith.ori %12, %14 : vector<8x16xi32>
    %cst = arith.constant dense<-2147483648> : vector<16xi32>
    %16 = vector.multi_reduction <maxsi>, %15, %cst [0] : vector<8x16xi32> to vector<16xi32>
    %17 = vector.shape_cast %16 : vector<16xi32> to vector<1x16xi32>
    %c7_i32_3 = arith.constant 7 : i32
    %18 = vector.broadcast %c7_i32_3 : i32 to vector<1x16xi32>
    %19 = arith.andi %17, %18 : vector<1x16xi32>
    %c7_i32_4 = arith.constant 7 : i32
    %20 = vector.broadcast %c7_i32_4 : i32 to vector<1x16xi32>
    %21 = arith.subi %20, %19 : vector<1x16xi32>
    %22 = vector.broadcast %21 : vector<1x16xi32> to vector<8x16xi32>
    %23 = arith.cmpi eq, %10, %22 : vector<8x16xi32>
    %cst_5 = arith.constant 0xFF800000 : f32
    %24 = vector.broadcast %cst_5 : f32 to vector<8x16xf32>
    %25 = arith.select %23, %3, %24 : vector<8x16xi1>, vector<8x16xf32>
    %cst_6 = arith.constant dense<0xFF800000> : vector<16xf32>
    %26 = vector.multi_reduction <maximumf>, %25, %cst_6 [0] : vector<8x16xf32> to vector<16xf32>
    %27 = vector.shape_cast %26 : vector<16xf32> to vector<1x16xf32>
    %c0_7 = arith.constant 0 : index
    %c0_8 = arith.constant 0 : index
    %28 = vector.load %arg3[%c0_7, %c0_8] : memref<2x16xi32, #tpu.memory_space<vmem>>, vector<1x16xi32>
    tpu.vector_store %arg3[%c0_7, %c0_8], %21 {strides = array<i32>} : memref<2x16xi32, #tpu.memory_space<vmem>>, vector<1x16xi32>,
    %29 = vector.broadcast %21 : vector<1x16xi32> to vector<8x16xi32>
    %30 = arith.cmpi eq, %10, %29 : vector<8x16xi32>
    %c-2147483648_i32 = arith.constant -2147483648 : i32
    %31 = vector.broadcast %c-2147483648_i32 : i32 to vector<8x16xi32>
    %32 = arith.select %30, %31, %15 : vector<8x16xi1>, vector<8x16xi32>
    %cst_9 = arith.constant dense<-2147483648> : vector<16xi32>
    %33 = vector.multi_reduction <maxsi>, %32, %cst_9 [0] : vector<8x16xi32> to vector<16xi32>
    %34 = vector.shape_cast %33 : vector<16xi32> to vector<1x16xi32>
    %c7_i32_10 = arith.constant 7 : i32
    %35 = vector.broadcast %c7_i32_10 : i32 to vector<1x16xi32>
    %36 = arith.andi %34, %35 : vector<1x16xi32>
    %c7_i32_11 = arith.constant 7 : i32
    %37 = vector.broadcast %c7_i32_11 : i32 to vector<1x16xi32>
    %38 = arith.subi %37, %36 : vector<1x16xi32>
    %39 = vector.broadcast %38 : vector<1x16xi32> to vector<8x16xi32>
    %40 = arith.cmpi eq, %10, %39 : vector<8x16xi32>
    %cst_12 = arith.constant 0xFF800000 : f32
    %41 = vector.broadcast %cst_12 : f32 to vector<8x16xf32>
    %42 = arith.select %40, %3, %41 : vector<8x16xi1>, vector<8x16xf32>
    %cst_13 = arith.constant dense<0xFF800000> : vector<16xf32>
    %43 = vector.multi_reduction <maximumf>, %42, %cst_13 [0] : vector<8x16xf32> to vector<16xf32>
    %44 = vector.shape_cast %43 : vector<16xf32> to vector<1x16xf32>
    %c1 = arith.constant 1 : index
    %c0_14 = arith.constant 0 : index
    %45 = vector.load %arg3[%c1, %c0_14] : memref<2x16xi32, #tpu.memory_space<vmem>>, vector<1x16xi32>
    tpu.vector_store %arg3[%c1, %c0_14], %38 {strides = array<i32>} : memref<2x16xi32, #tpu.memory_space<vmem>>, vector<1x16xi32>,
    %46 = arith.maximumf %27, %44 : vector<1x16xf32>
    %47 = arith.subf %27, %46 : vector<1x16xf32>
    %48 = math.exp %47 : vector<1x16xf32>
    %49 = arith.subf %44, %46 : vector<1x16xf32>
    %50 = math.exp %49 : vector<1x16xf32>
    %51 = arith.addf %48, %50 : vector<1x16xf32>
    %52 = tpu.reciprocal %51 {approx = true} : vector<1x16xf32> -> vector<1x16xf32>
    %53 = arith.mulf %48, %52 : vector<1x16xf32>
    %c0_15 = arith.constant 0 : index
    %c0_16 = arith.constant 0 : index
    %54 = vector.load %arg4[%c0_15, %c0_16] : memref<2x16xf32, #tpu.memory_space<vmem>>, vector<1x16xf32>
    tpu.vector_store %arg4[%c0_15, %c0_16], %53 {strides = array<i32>} : memref<2x16xf32, #tpu.memory_space<vmem>>, vector<1x16xf32>,
    %55 = arith.mulf %50, %52 : vector<1x16xf32>
    %c1_17 = arith.constant 1 : index
    %c0_18 = arith.constant 0 : index
    %56 = vector.load %arg4[%c1_17, %c0_18] : memref<2x16xf32, #tpu.memory_space<vmem>>, vector<1x16xf32>
    tpu.vector_store %arg4[%c1_17, %c0_18], %55 {strides = array<i32>} : memref<2x16xf32, #tpu.memory_space<vmem>>, vector<1x16xf32>,
    return
  }
  func.func @transform_0(%arg0: i32) -> (i32, i32) {
    %c0_i32 = arith.constant 0 : i32
    %c0_i32_0 = arith.constant 0 : i32
    return %c0_i32, %arg0 : i32, i32
  }
  func.func @transform_1(%arg0: i32) -> (i32, i32) {
    %c0_i32 = arith.constant 0 : i32
    %c0_i32_0 = arith.constant 0 : i32
    %c0_i32_1 = arith.constant 0 : i32
    return %c0_i32, %c0_i32_0 : i32, i32
  }
  func.func @transform_2(%arg0: i32) -> (i32, i32) {
    %c0_i32 = arith.constant 0 : i32
    %c0_i32_0 = arith.constant 0 : i32
    return %c0_i32, %arg0 : i32, i32
  }
  func.func @transform_3(%arg0: i32) -> (i32, i32) {
    %c0_i32 = arith.constant 0 : i32
    %c0_i32_0 = arith.constant 0 : i32
    return %c0_i32, %arg0 : i32, i32
  }
}

</mosaic_0001>

<bundles_post_ra>
// kernel: tpu_custom_call.1
= control target key start
LH: loop header
LB: loop body
LE: loop exit
PB: predicated region body
PF: predicated region fallthrough
CT: control target
= control target key end

     0   :  { %9 = vsyncpa [#allocation3], 0  ;;  %s266_s0 = inlined_call_operand.vmem [shape: f32[16,8], index: 0, kind: input, shape index: {}]   ;;  %s267_s1 = inlined_call_operand.vmem [shape: f32[8,1], index: 1, kind: input, shape index: {}]   ;;  %s268_s2 = inlined_call_operand.hbm [shape: s32[2,16], index: 2, kind: output, shape index: {0}]   ;;  %s269_s3 = inlined_call_operand.hbm [shape: f32[2,16], index: 3, kind: output, shape index: {1}]  }
   0x1   :  { %v49_v0 = vld [vmem:[%s267_s1] sm:$0xff] }
   0x2   :  { %10 = vsyncpa [#allocation5], 0  ;;  %v220_v1 = vmov 0   ;;  %v15_v2 = vld [vmem:[%s266_s0] sm:$0xff]  ;;  %v16_v3 = vld [vmem:[%s266_s0 + $0x8] sm:$0xff]  ;;  %v60_v5 = vlaneseq  ;;  %vm65_vm0 = vcmask 130048  }
   0x3   :  { %161 = vset.pattern.permute.xlu0 %v220_v1  ;;  %vm87_vm4 = vcmask 122880   ;;  %s221_s0 = smov [#allocation2]   ;;  %s132_s20 = sshll.u32 %s268_s2, 4  ;;  %s133_s20 = int_to_ptr.hbm [resolvable:$true] %s132_s20 }
   0x4   :  { %52 = vperm.xlu0 %161, %v49_v0   ;;  %v61_v9 = vshrl.u32 %v60_v5, 7  ;;  %s130_s1 = sshll.u32 %s221_s0, 4  ;;  %s222_s2 = smov [#allocation4]   ;;  %s131_s1 = int_to_ptr.vmem [resolvable:$true] %s130_s1 }
   0x5   :  { %s141_s21 = sshll.u32 %s222_s2, 4  ;;  %s143_s24 = sshll.u32 %s269_s3, 4  ;;  %s142_s21 = int_to_ptr.vmem [resolvable:$true] %s141_s21  ;;  %s144_s24 = int_to_ptr.hbm [resolvable:$true] %s143_s24 }
   0x6   :  { %v63_v12 = vsub.s32 7, %v61_v9 }
  0x26   :  { %17 = vxpose.xlu0.b32.start [1/2] (short) (narrow) %v15_v2, 8 }
  0x2e   :  { %18 = vxpose.xlu0.b32.end [2/2] (short) (narrow) %v16_v3, 8 }
  0x76   :  { %v53_v4 = vpop.permute.xlu0 %52 }
  0xca   :  { %v33_v6 = vpop.trf.xlu0 }
  0xcb   :  { %v55_v7 = vadd.f32 %v53_v4, %v33_v6 }
  0xcd   :  { %v57_v8 = vshra.s32 %v55_v7, 31 }
  0xcf   :  { %v58_v10 = vand.u32 2147483647, %v57_v8 }
  0xd1   :  { %v59_v11 = vxor.u32 %v58_v10, %v55_v7 }
  0xd3   :  { %v62_v13 = vand.u32 4294967288, %v59_v11 }
  0xd5   :  { %v64_v14 = vor.u32 %v63_v12, %v62_v13 }
  0xd7   :  { %v66_v15 = vsel %vm65_vm0, %v64_v14, 2147483648 }
  0xd8   :  { %v67_v16 = vrot.slane %v66_v15, 4 }
  0xda   :  { %vm68_vm1 = vcmp.gt.s32.totalorder %v66_v15, %v67_v16 }
  0xdb   :  { %v69_v17 = vsel %vm68_vm1, %v66_v15, %v67_v16 }
  0xdc   :  { %v70_v18 = vrot.slane %v69_v17, 2 }
  0xde   :  { %vm71_vm2 = vcmp.gt.s32.totalorder %v69_v17, %v70_v18 }
  0xdf   :  { %v72_v19 = vsel %vm71_vm2, %v69_v17, %v70_v18 }
  0xe0   :  { %v73_v20 = vrot.slane %v72_v19, 1 }
  0xe2   :  { %vm74_vm3 = vcmp.gt.s32.totalorder %v72_v19, %v73_v20 }
  0xe3   :  { %v75_v21 = vsel %vm74_vm3, %v72_v19, %v73_v20 }
  0xe4   :  { %v76_v22 = vand.u32 7, %v75_v21 }
  0xe6   :  { %v77_v23 = vsub.s32 7, %v76_v22 }
  0xe8   :  { %vm78_vm5 = vcmp.eq.s32.totalorder %v61_v9, %v77_v23  ;;  %88 = vst.msk [vmem:[#allocation2] sm:$0x1] %vm87_vm4, %v77_v23 }
  0xe9   :  { %v89_v24 = vsel %vm78_vm5, 2147483648, %v64_v14  ;;  %v79_v27 = vsel %vm78_vm5, %v55_v7, -inf }
  0xea   :  { %v90_v25 = vsel %vm65_vm0, %v89_v24, 2147483648  ;;  %v80_v30 = vsel %vm65_vm0, %v79_v27, -inf }
  0xeb   :  { %v91_v26 = vrot.slane %v90_v25, 4  ;;  %v81_v33 = vrot.slane %v80_v30, 4 }
  0xed   :  { %vm92_vm6 = vcmp.gt.s32.totalorder %v90_v25, %v91_v26  ;;  %v82_v36 = vmax.f32 %v80_v30, %v81_v33 }
  0xee   :  { %v93_v28 = vsel %vm92_vm6, %v90_v25, %v91_v26 }
  0xef   :  { %v94_v29 = vrot.slane %v93_v28, 2  ;;  %v83_v38 = vrot.slane %v82_v36, 2 }
  0xf1   :  { %vm95_vm7 = vcmp.gt.s32.totalorder %v93_v28, %v94_v29  ;;  %v84_v42 = vmax.f32 %v82_v36, %v83_v38 }
  0xf2   :  { %v96_v31 = vsel %vm95_vm7, %v93_v28, %v94_v29 }
  0xf3   :  { %v97_v32 = vrot.slane %v96_v31, 1  ;;  %v85_v45 = vrot.slane %v84_v42, 1 }
  0xf5   :  { %vm98_vm8 = vcmp.gt.s32.totalorder %v96_v31, %v97_v32  ;;  %v86_v48 = vmax.f32 %v84_v42, %v85_v45 }
  0xf6   :  { %v99_v34 = vsel %vm98_vm8, %v96_v31, %v97_v32 }
  0xf7   :  { %v100_v35 = vand.u32 7, %v99_v34 }
  0xf9   :  { %v101_v37 = vsub.s32 7, %v100_v35 }
  0xfb   :  { %vm102_vm9 = vcmp.eq.s32.totalorder %v61_v9, %v101_v37  ;;  %111 = vst.msk [vmem:[#allocation2 + $0x1] sm:$0x1] %vm87_vm4, %v101_v37 }
  0xfc   :  { %v103_v39 = vsel %vm102_vm9, %v55_v7, -inf  ;;  %135 = dma.vmem_to_hbm [thread:$0]  %s131_s1, 32, %s133_s20, [#allocation3]  }
  0xfd   :  { %v104_v40 = vsel %vm65_vm0, %v103_v39, -inf }
  0xfe   :  { %v105_v41 = vrot.slane %v104_v40, 4 }
 0x100   :  { %v106_v43 = vmax.f32 %v104_v40, %v105_v41 }
 0x102   :  { %v107_v44 = vrot.slane %v106_v43, 2 }
 0x104   :  { %v108_v46 = vmax.f32 %v106_v43, %v107_v44 }
 0x106   :  { %v109_v47 = vrot.slane %v108_v46, 1 }
 0x108   :  { %v110_v49 = vmax.f32 %v108_v46, %v109_v47 }
 0x10a   :  { %v112_v50 = vmax.f32 %v86_v48, %v110_v49 }
 0x10c   :  { %v113_v51 = vsub.f32 %v86_v48, %v112_v50  ;;  %v116_v52 = vsub.f32 %v110_v49, %v112_v50 }
 0x10e   :  { %v114_v53 = vmul.f32 1.442695, %v113_v51  ;;  %v117_v54 = vmul.f32 1.442695, %v116_v52 }
 0x110   :  { %162 = vpow2.f32 %v114_v53 }
 0x111   :  { %164 = vpow2.f32 %v117_v54 }
 0x116   :  { %v163_v55 = vpop.eup %162 }
 0x117   :  { %v165_v56 = vpop.eup %164 }
 0x118   :  { %v119_v57 = vadd.f32 %v165_v56, %v163_v55 }
 0x11a   :  { %166 = vrcp.f32 %v119_v57 }
 0x120   :  { %v167_v58 = vpop.eup %166 }
 0x121   :  { %v121_v59 = vmul.f32 %v167_v58, %v163_v55  ;;  %v123_v60 = vmul.f32 %v167_v58, %v165_v56 }
 0x123   :  { %122 = vst.msk [vmem:[#allocation4] sm:$0x1] %vm87_vm4, %v121_v59 }
 0x124   :  { %124 = vst.msk [vmem:[#allocation4 + $0x1] sm:$0x1] %vm87_vm4, %v123_v60 }
 0x125   :  { %146 = dma.vmem_to_hbm [thread:$0]  %s142_s21, 32, %s144_s24, [#allocation5]  }
 0x126   :  { %216 = dma.done.wait [#allocation3], 32  }
 0x127   :  { %217 = vsyncadd [#allocation3], 4294967264 }
 0x128   :  { %218 = dma.done.wait [#allocation5], 32  }
 0x129   :  { %219 = vsyncadd [#allocation5], 4294967264 }
 0x12a   :  { %155 = vsyncpa [#allocation3], 1 }
 0x12b   :  { %156 = vsyncpa [#allocation5], 1 }

// kernel: tpu_custom_call.1
= control target key start
LH: loop header
LB: loop body
LE: loop exit
PB: predicated region body
PF: predicated region fallthrough
CT: control target
= control target key end

     0   :  { %9 = vsyncpa [#allocation3], 0  ;;  %s229_s0 = inlined_call_operand.vmem [shape: f32[8,16], index: 0, kind: input, shape index: {}]   ;;  %s230_s1 = inlined_call_operand.vmem [shape: f32[8,1], index: 1, kind: input, shape index: {}]   ;;  %s231_s2 = inlined_call_operand.hbm [shape: s32[2,16], index: 2, kind: output, shape index: {0}]   ;;  %s232_s3 = inlined_call_operand.hbm [shape: f32[2,16], index: 3, kind: output, shape index: {1}]  }
   0x1   :  { %v16_v0 = vld [vmem:[%s230_s1] sm:$0xff] }
   0x2   :  { %10 = vsyncpa [#allocation5], 0  ;;  %v186_v1 = vmov 0   ;;  %v15_v2 = vld [vmem:[%s229_s0] sm:$0xff]  ;;  %v27_v3 = vlaneseq  ;;  %vm32_vm0 = vcmask 130048   ;;  %vm54_vm4 = vcmask 122880  }
   0x3   :  { %127 = vset.pattern.permute.xlu0 %v186_v1  ;;  %s187_s0 = smov [#allocation2]   ;;  %s99_s18 = sshll.u32 %s231_s2, 4  ;;  %s100_s18 = int_to_ptr.hbm [resolvable:$true] %s99_s18 }
   0x4   :  { %19 = vperm.xlu0 %127, %v16_v0   ;;  %v28_v7 = vshrl.u32 %v27_v3, 7  ;;  %s97_s1 = sshll.u32 %s187_s0, 4  ;;  %s188_s2 = smov [#allocation4]   ;;  %s98_s1 = int_to_ptr.vmem [resolvable:$true] %s97_s1 }
   0x5   :  { %s108_s19 = sshll.u32 %s188_s2, 4  ;;  %s110_s22 = sshll.u32 %s232_s3, 4  ;;  %s109_s19 = int_to_ptr.vmem [resolvable:$true] %s108_s19  ;;  %s111_s22 = int_to_ptr.hbm [resolvable:$true] %s110_s22 }
   0x6   :  { %v30_v10 = vsub.s32 7, %v28_v7 }
  0x76   :  { %v20_v4 = vpop.permute.xlu0 %19 }
  0x77   :  { %v22_v5 = vadd.f32 %v20_v4, %v15_v2 }
  0x79   :  { %v24_v6 = vshra.s32 %v22_v5, 31 }
  0x7b   :  { %v25_v8 = vand.u32 2147483647, %v24_v6 }
  0x7d   :  { %v26_v9 = vxor.u32 %v25_v8, %v22_v5 }
  0x7f   :  { %v29_v11 = vand.u32 4294967288, %v26_v9 }
  0x81   :  { %v31_v12 = vor.u32 %v30_v10, %v29_v11 }
  0x83   :  { %v33_v13 = vsel %vm32_vm0, %v31_v12, 2147483648 }
  0x84   :  { %v34_v14 = vrot.slane %v33_v13, 4 }
  0x86   :  { %vm35_vm1 = vcmp.gt.s32.totalorder %v33_v13, %v34_v14 }
  0x87   :  { %v36_v15 = vsel %vm35_vm1, %v33_v13, %v34_v14 }
  0x88   :  { %v37_v16 = vrot.slane %v36_v15, 2 }
  0x8a   :  { %vm38_vm2 = vcmp.gt.s32.totalorder %v36_v15, %v37_v16 }
  0x8b   :  { %v39_v17 = vsel %vm38_vm2, %v36_v15, %v37_v16 }
  0x8c   :  { %v40_v18 = vrot.slane %v39_v17, 1 }
  0x8e   :  { %vm41_vm3 = vcmp.gt.s32.totalorder %v39_v17, %v40_v18 }
  0x8f   :  { %v42_v19 = vsel %vm41_vm3, %v39_v17, %v40_v18 }
  0x90   :  { %v43_v20 = vand.u32 7, %v42_v19 }
  0x92   :  { %v44_v21 = vsub.s32 7, %v43_v20 }
  0x94   :  { %vm45_vm5 = vcmp.eq.s32.totalorder %v28_v7, %v44_v21  ;;  %55 = vst.msk [vmem:[#allocation2] sm:$0x1] %vm54_vm4, %v44_v21 }
  0x95   :  { %v56_v22 = vsel %vm45_vm5, 2147483648, %v31_v12  ;;  %v46_v25 = vsel %vm45_vm5, %v22_v5, -inf }
  0x96   :  { %v57_v23 = vsel %vm32_vm0, %v56_v22, 2147483648  ;;  %v47_v28 = vsel %vm32_vm0, %v46_v25, -inf }
  0x97   :  { %v58_v24 = vrot.slane %v57_v23, 4  ;;  %v48_v31 = vrot.slane %v47_v28, 4 }
  0x99   :  { %vm59_vm6 = vcmp.gt.s32.totalorder %v57_v23, %v58_v24  ;;  %v49_v34 = vmax.f32 %v47_v28, %v48_v31 }
  0x9a   :  { %v60_v26 = vsel %vm59_vm6, %v57_v23, %v58_v24 }
  0x9b   :  { %v61_v27 = vrot.slane %v60_v26, 2  ;;  %v50_v36 = vrot.slane %v49_v34, 2 }
  0x9d   :  { %vm62_vm7 = vcmp.gt.s32.totalorder %v60_v26, %v61_v27  ;;  %v51_v40 = vmax.f32 %v49_v34, %v50_v36 }
  0x9e   :  { %v63_v29 = vsel %vm62_vm7, %v60_v26, %v61_v27 }
  0x9f   :  { %v64_v30 = vrot.slane %v63_v29, 1  ;;  %v52_v43 = vrot.slane %v51_v40, 1 }
  0xa1   :  { %vm65_vm8 = vcmp.gt.s32.totalorder %v63_v29, %v64_v30  ;;  %v53_v46 = vmax.f32 %v51_v40, %v52_v43 }
  0xa2   :  { %v66_v32 = vsel %vm65_vm8, %v63_v29, %v64_v30 }
  0xa3   :  { %v67_v33 = vand.u32 7, %v66_v32 }
  0xa5   :  { %v68_v35 = vsub.s32 7, %v67_v33 }
  0xa7   :  { %vm69_vm9 = vcmp.eq.s32.totalorder %v28_v7, %v68_v35  ;;  %78 = vst.msk [vmem:[#allocation2 + $0x1] sm:$0x1] %vm54_vm4, %v68_v35 }
  0xa8   :  { %v70_v37 = vsel %vm69_vm9, %v22_v5, -inf  ;;  %102 = dma.vmem_to_hbm [thread:$0]  %s98_s1, 32, %s100_s18, [#allocation3]  }
  0xa9   :  { %v71_v38 = vsel %vm32_vm0, %v70_v37, -inf }
  0xaa   :  { %v72_v39 = vrot.slane %v71_v38, 4 }
  0xac   :  { %v73_v41 = vmax.f32 %v71_v38, %v72_v39 }
  0xae   :  { %v74_v42 = vrot.slane %v73_v41, 2 }
  0xb0   :  { %v75_v44 = vmax.f32 %v73_v41, %v74_v42 }
  0xb2   :  { %v76_v45 = vrot.slane %v75_v44, 1 }
  0xb4   :  { %v77_v47 = vmax.f32 %v75_v44, %v76_v45 }
  0xb6   :  { %v79_v48 = vmax.f32 %v53_v46, %v77_v47 }
  0xb8   :  { %v80_v49 = vsub.f32 %v53_v46, %v79_v48  ;;  %v83_v50 = vsub.f32 %v77_v47, %v79_v48 }
  0xba   :  { %v81_v51 = vmul.f32 1.442695, %v80_v49  ;;  %v84_v52 = vmul.f32 1.442695, %v83_v50 }
  0xbc   :  { %128 = vpow2.f32 %v81_v51 }
  0xbd   :  { %130 = vpow2.f32 %v84_v52 }
  0xc2   :  { %v129_v53 = vpop.eup %128 }
  0xc3   :  { %v131_v54 = vpop.eup %130 }
  0xc4   :  { %v86_v55 = vadd.f32 %v131_v54, %v129_v53 }
  0xc6   :  { %132 = vrcp.f32 %v86_v55 }
  0xcc   :  { %v133_v56 = vpop.eup %132 }
  0xcd   :  { %v88_v57 = vmul.f32 %v133_v56, %v129_v53  ;;  %v90_v58 = vmul.f32 %v133_v56, %v131_v54 }
  0xcf   :  { %89 = vst.msk [vmem:[#allocation4] sm:$0x1] %vm54_vm4, %v88_v57 }
  0xd0   :  { %91 = vst.msk [vmem:[#allocation4 + $0x1] sm:$0x1] %vm54_vm4, %v90_v58 }
  0xd1   :  { %113 = dma.vmem_to_hbm [thread:$0]  %s109_s19, 32, %s111_s22, [#allocation5]  }
  0xd2   :  { %182 = dma.done.wait [#allocation3], 32  }
  0xd3   :  { %183 = vsyncadd [#allocation3], 4294967264 }
  0xd4   :  { %184 = dma.done.wait [#allocation5], 32  }
  0xd5   :  { %185 = vsyncadd [#allocation5], 4294967264 }
  0xd6   :  { %122 = vsyncpa [#allocation3], 1 }
  0xd7   :  { %123 = vsyncpa [#allocation5], 1 }

</bundles_post_ra>
